<compile_context>
chip_gen: v6e
topology: v6e:2x2x1
jax: 0.10.0
libtpu: 0.0.40
codegen_flags: <defaults>
</compile_context>

<pallas_src>
import functools
import math

import jax
import jax.numpy as jnp
from jax import lax
from jax.experimental import pallas as pl
from jax.experimental.pallas import tpu as pltpu


def _round_up(x: int, m: int) -> int:
    return ((x + m - 1) // m) * m


def _device_kind() -> str:
    try:
        return jax.devices()[0].device_kind.lower()
    except Exception:
        return ""


def _cores_per_chip() -> int:
    # Chips with 2 TensorCores behind one device (megacore / v7x): v4, v5p, v7x.
    # v5e / v6e are single-TC; the heuristic is harmless if it misses.
    kind = _device_kind()
    return 2 if any(tag in kind for tag in ("v4", "v5p", "v7")) else 1


def _default_carry_dtype():
    # v5e has no bf16 VPU -> keep the inter-layer activation in f32 there.
    # v6e/v7x have native bf16 VALU, so a bf16 carry halves vreg/VMEM traffic.
    kind = _device_kind()
    if ("v5e" in kind) or ("v5 lite" in kind) or ("v5lite" in kind):
        return jnp.float32
    return jnp.bfloat16


def _choose_tm(m: int, tm_max: int, cores: int) -> int:
    """Pick the batch-tile size (lane dim of the output block)."""
    min_split = 128 * max(cores, 1)
    if m <= tm_max and (cores < 2 or m < min_split):
        # Single tile == full batch: block shapes equal the full array dims,
        # so no (8,128) padding/masking is needed at all.
        return m
    # Number of tiles: enough to respect tm_max, rounded up to a multiple of
    # the per-chip TensorCore count so the "parallel" axis splits evenly.
    steps = max(pl.cdiv(m, tm_max), cores)
    if cores > 1 and steps % cores:
        steps += cores - (steps % cores)
    tm = _round_up(pl.cdiv(m, steps), 128)   # lane dim must be a multiple of 128
    return m if tm >= m else tm


def _mlp_fused_kernel(x_ref, *refs, num_layers: int, compute_dtype, carry_dtype):
    """(Linear -> ReLU) * (L-1) -> Linear on one batch tile, batch in lanes.

    Activations are kept transposed, h^T: [features, batch_tile], so every
    intermediate and the output block is lane-dense (full-width stores) and
    the MXU N dimension is the batch tile.

    refs = (w1, b1, ..., wL, bL, out); w_i: [out_i, in_i] in `compute_dtype`
    (native nn.Linear layout), b_i: [out_i, 1] f32.
    """
    o_ref = refs[-1]
    wb = refs[:-1]

    # Layer 1: contract on x's last (feature) dim so the batch dim lands in
    # lanes:  h1^T[n1, tm] = W1[n1, k0] . x[tm, k0]^T   (bf16 in, f32 MXU acc)
    h = lax.dot_general(
        wb[0][...],
        x_ref[...].astype(compute_dtype),
        dimension_numbers=(((1,), (1,)), ((), ())),
        preferred_element_type=jnp.float32,
    )
    h = h + wb[1][...]                      # bias [n1, 1] broadcasts over lanes (f32)
    if num_layers > 1:
        h = jnp.maximum(h.astype(carry_dtype), 0)   # ReLU (bf16 carry on v6e/v7x)
        # TODO(synk): dropout has p=0.0 (identity); for p>0 apply a
        # pltpu.prng_seed / pltpu.prng_random_bits mask here.

    for i in range(1, num_layers):
        w_ref, b_ref = wb[2 * i], wb[2 * i + 1]
        y = jnp.dot(
            w_ref[...],
            h.astype(compute_dtype),
            preferred_element_type=jnp.float32,
        )
        y = y + b_ref[...]
        if i < num_layers - 1:
            y = jnp.maximum(y.astype(carry_dtype), 0)
        h = y

    o_ref[...] = h.astype(o_ref.dtype)


def mlp_forward_fused(params, x, *, compute_dtype=jnp.bfloat16, tm_max=2048,
                      out_dtype=None, carry_dtype=None, transposed_output=False):
    """Forward pass matching MLP.forward, fully fused into one pallas_call.

    params: list of (w, b); w [out_i, in_i] (native nn.Linear layout) f32,
            b [out_i, 1] f32.
    x:      [M, K0]; f32 or bf16.  If the producer can emit bf16, pass it
            directly (do NOT astype here) -- it halves the x HBM read.

    The kernel writes a lane-dense [n_out, M] slab; by default the wrapper
    transposes that tiny slab back to the module's [M, n_out] layout.  Pass
    transposed_output=True if the consumer can take [n_out, M] directly.
    """
    M, K0 = x.shape
    num_layers = len(params)
    n_out = params[-1][0].shape[0]
    out_dtype = x.dtype if out_dtype is None else out_dtype
    carry_dtype = _default_carry_dtype() if carry_dtype is None else carry_dtype

    tm = _choose_tm(M, tm_max, _cores_per_chip())
    grid = (pl.cdiv(M, tm),)

    flat_inputs = [x]
    for (w, b) in params:
        flat_inputs.append(w.astype(compute_dtype))   # tiny one-time cast
        flat_inputs.append(b)

    def _build_and_call(single_buffer_weights: bool):
        # Weights/biases: full-array blocks with a constant index_map stay
        # VMEM-resident across the whole grid (one DMA each); Buffered(1)
        # drops their (dead) second pipeline buffer.
        wb_kw = {"pipeline_mode": pl.Buffered(1)} if single_buffer_weights else {}
        in_specs = [pl.BlockSpec((tm, K0), lambda i: (i, 0))]
        for (w, b) in params:
            n_i, k_i = w.shape
            in_specs.append(pl.BlockSpec((n_i, k_i), lambda i: (0, 0), **wb_kw))
            in_specs.append(pl.BlockSpec((n_i, 1), lambda i: (0, 0), **wb_kw))
        return pl.pallas_call(
            functools.partial(
                _mlp_fused_kernel,
                num_layers=num_layers,
                compute_dtype=compute_dtype,
                carry_dtype=carry_dtype,
            ),
            out_shape=jax.ShapeDtypeStruct((n_out, M), out_dtype),
            grid=grid,
            in_specs=in_specs,
            out_specs=pl.BlockSpec((n_out, tm), lambda i: (0, i)),
            compiler_params=pltpu.CompilerParams(
                dimension_semantics=("parallel",),
            ),
        )(*flat_inputs)

    try:
        y_t = _build_and_call(True)
    except Exception:
        # Guard: if this jax version rejects pipeline_mode=pl.Buffered(1),
        # fall back to the default double-buffered (still single-DMA) specs.
        y_t = _build_and_call(False)

    return y_t if transposed_output else y_t.T


def mlp_reference(params, x, *, compute_dtype=jnp.bfloat16, carry_dtype=jnp.bfloat16):
    """Plain-JAX reference mirroring the kernel's bf16-in / f32-accumulate math."""
    h = x
    n = len(params)
    for i, (w, b) in enumerate(params):
        y = jnp.dot(
            h.astype(compute_dtype),
            w.astype(compute_dtype).T,
            preferred_element_type=jnp.float32,
        ) + b[:, 0]
        if i < n - 1:
            y = jnp.maximum(y.astype(carry_dtype), 0)
        h = y
    return h.astype(jnp.float32)


def init_mlp_params(key, dims):
    """Deterministic init mimicking nn.Linear default (uniform +/- 1/sqrt(fan_in)).

    Weights stay in native nn.Linear layout [out, in]; biases stored as [out, 1]
    so they broadcast over the lane (batch) dim inside the kernel.
    """
    params = []
    for i in range(len(dims) - 1):
        fan_in, fan_out = dims[i], dims[i + 1]
        key, kw, kb = jax.random.split(key, 3)
        bound = 1.0 / math.sqrt(fan_in)
        w = jax.random.uniform(kw, (fan_out, fan_in), jnp.float32, -bound, bound)
        b = jax.random.uniform(kb, (fan_out, 1), jnp.float32, -bound, bound)
        params.append((w, b))
    return params


if __name__ == "__main__":
    key = jax.random.PRNGKey(0)
    dims = [32, 64, 48, 16]          # `dim` argument of MLP.__init__
    params = init_mlp_params(key, dims)
    carry = _default_carry_dtype()

    # Case 1: small batch (single full-array tile, grid of 1).
    key, kx = jax.random.split(key)
    x_small = jax.random.normal(kx, (8, dims[0]), jnp.float32)
    y_small = mlp_forward_fused(params, x_small)
    jax.block_until_ready(y_small)
    assert y_small.shape == (8, dims[-1])
    ref_small = mlp_reference(params, x_small, carry_dtype=carry)
    assert jnp.allclose(y_small, ref_small, atol=5e-3, rtol=5e-3)
    ref_f32 = mlp_reference(params, x_small, compute_dtype=jnp.float32,
                            carry_dtype=jnp.float32)
    assert jnp.allclose(y_small, ref_f32, atol=5e-2, rtol=5e-2)

    # Case 2: non-multiple-of-128 batch (single tile on 1-TC chips, even 2-tile
    # split with a masked ragged last block on 2-TC chips).
    key, kx2 = jax.random.split(key)
    x_big = jax.random.normal(kx2, (1000, dims[0]), jnp.float32)
    y_big = mlp_forward_fused(params, x_big)
    jax.block_until_ready(y_big)
    assert y_big.shape == (1000, dims[-1])
    ref_big = mlp_reference(params, x_big, carry_dtype=carry)
    assert jnp.allclose(y_big, ref_big, atol=5e-3, rtol=5e-3)

    # Case 3: batch large enough to need multiple tiles on every chip
    # (exercises tm_max tiling + ragged masked last block, no pad/slice copies).
    key, kx3 = jax.random.split(key)
    x_large = jax.random.normal(kx3, (4136, dims[0]), jnp.float32)
    y_large = mlp_forward_fused(params, x_large)
    jax.block_until_ready(y_large)
    assert y_large.shape == (4136, dims[-1])
    ref_large = mlp_reference(params, x_large, carry_dtype=carry)
    assert jnp.allclose(y_large, ref_large, atol=5e-3, rtol=5e-3)

    print("KERNEL_OK")
</pallas_src>

<mosaic_0001>
module attributes {stable_mosaic.version = 11 : i64} {
  func.func @_mlp_fused_kernel(%arg0: i32, %arg1: memref<8x32xf32, #tpu.memory_space<vmem>>, %arg2: memref<64x32xbf16, #tpu.memory_space<vmem>>, %arg3: memref<64x1xf32, #tpu.memory_space<vmem>>, %arg4: memref<48x64xbf16, #tpu.memory_space<vmem>>, %arg5: memref<48x1xf32, #tpu.memory_space<vmem>>, %arg6: memref<16x48xbf16, #tpu.memory_space<vmem>>, %arg7: memref<16x1xf32, #tpu.memory_space<vmem>>, %arg8: memref<16x8xf32, #tpu.memory_space<vmem>>) attributes {dimension_semantics = [#tpu.dimension_semantics<parallel>], iteration_bounds = array<i64: 1>, scalar_prefetch = 0 : i64, scratch_operands = 0 : i64, tpu.core_type = #tpu.core_type<tc>, window_params = [{transform_indices = @transform_0, window_bounds = array<i64: 8, 32>}, {pipeline_mode = #tpu.pipeline_mode<synchronous>, transform_indices = @transform_1, window_bounds = array<i64: 64, 32>}, {pipeline_mode = #tpu.pipeline_mode<synchronous>, transform_indices = @transform_2, window_bounds = array<i64: 64, 1>}, {pipeline_mode = #tpu.pipeline_mode<synchronous>, transform_indices = @transform_3, window_bounds = array<i64: 48, 64>}, {pipeline_mode = #tpu.pipeline_mode<synchronous>, transform_indices = @transform_4, window_bounds = array<i64: 48, 1>}, {pipeline_mode = #tpu.pipeline_mode<synchronous>, transform_indices = @transform_5, window_bounds = array<i64: 16, 48>}, {pipeline_mode = #tpu.pipeline_mode<synchronous>, transform_indices = @transform_6, window_bounds = array<i64: 16, 1>}, {transform_indices = @transform_7, window_bounds = array<i64: 16, 8>}]} {
    %c0 = arith.constant 0 : index
    %c0_0 = arith.constant 0 : index
    %0 = vector.load %arg2[%c0, %c0_0] : memref<64x32xbf16, #tpu.memory_space<vmem>>, vector<64x32xbf16>
    %c0_1 = arith.constant 0 : index
    %c0_2 = arith.constant 0 : index
    %1 = vector.load %arg1[%c0_1, %c0_2] : memref<8x32xf32, #tpu.memory_space<vmem>>, vector<8x32xf32>
    %2 = arith.truncf %1 : vector<8x32xf32> to vector<8x32xbf16>
    %cst = arith.constant dense<0.000000e+00> : vector<64x8xf32>
    %3 = tpu.matmul %0, %2, %cst {dimension_numbers = #tpu.dot_dimension_numbers<[1], [1], [0], [0], [0, 0, 1, 0], [], []>} : vector<64x32xbf16>, vector<8x32xbf16>, vector<64x8xf32> -> vector<64x8xf32>
    %c0_3 = arith.constant 0 : index
    %c0_4 = arith.constant 0 : index
    %4 = vector.load %arg3[%c0_3, %c0_4] : memref<64x1xf32, #tpu.memory_space<vmem>>, vector<64x1xf32>
    %5 = vector.broadcast %4 : vector<64x1xf32> to vector<64x8xf32>
    %6 = arith.addf %3, %5 : vector<64x8xf32>
    %7 = arith.truncf %6 : vector<64x8xf32> to vector<64x8xbf16>
    %cst_5 = arith.constant 0.000000e+00 : bf16
    %8 = vector.broadcast %cst_5 : bf16 to vector<64x8xbf16>
    %9 = arith.maximumf %7, %8 : vector<64x8xbf16>
    %c0_6 = arith.constant 0 : index
    %c0_7 = arith.constant 0 : index
    %10 = vector.load %arg4[%c0_6, %c0_7] : memref<48x64xbf16, #tpu.memory_space<vmem>>, vector<48x64xbf16>
    %cst_8 = arith.constant dense<0.000000e+00> : vector<48x8xf32>
    %11 = tpu.matmul %10, %9, %cst_8 {dimension_numbers = #tpu.dot_dimension_numbers<[1], [0], [0], [1], [0, 0, 1, 1], [], []>} : vector<48x64xbf16>, vector<64x8xbf16>, vector<48x8xf32> -> vector<48x8xf32>
    %c0_9 = arith.constant 0 : index
    %c0_10 = arith.constant 0 : index
    %12 = vector.load %arg5[%c0_9, %c0_10] : memref<48x1xf32, #tpu.memory_space<vmem>>, vector<48x1xf32>
    %13 = vector.broadcast %12 : vector<48x1xf32> to vector<48x8xf32>
    %14 = arith.addf %11, %13 : vector<48x8xf32>
    %15 = arith.truncf %14 : vector<48x8xf32> to vector<48x8xbf16>
    %cst_11 = arith.constant 0.000000e+00 : bf16
    %16 = vector.broadcast %cst_11 : bf16 to vector<48x8xbf16>
    %17 = arith.maximumf %15, %16 : vector<48x8xbf16>
    %c0_12 = arith.constant 0 : index
    %c0_13 = arith.constant 0 : index
    %18 = vector.load %arg6[%c0_12, %c0_13] : memref<16x48xbf16, #tpu.memory_space<vmem>>, vector<16x48xbf16>
    %cst_14 = arith.constant dense<0.000000e+00> : vector<16x8xf32>
    %19 = tpu.matmul %18, %17, %cst_14 {dimension_numbers = #tpu.dot_dimension_numbers<[1], [0], [0], [1], [0, 0, 1, 1], [], []>} : vector<16x48xbf16>, vector<48x8xbf16>, vector<16x8xf32> -> vector<16x8xf32>
    %c0_15 = arith.constant 0 : index
    %c0_16 = arith.constant 0 : index
    %20 = vector.load %arg7[%c0_15, %c0_16] : memref<16x1xf32, #tpu.memory_space<vmem>>, vector<16x1xf32>
    %21 = vector.broadcast %20 : vector<16x1xf32> to vector<16x8xf32>
    %22 = arith.addf %19, %21 : vector<16x8xf32>
    %c0_17 = arith.constant 0 : index
    %c0_18 = arith.constant 0 : index
    %23 = vector.load %arg8[%c0_17, %c0_18] : memref<16x8xf32, #tpu.memory_space<vmem>>, vector<16x8xf32>
    tpu.vector_store %arg8[%c0_17, %c0_18], %22 {strides = array<i32>} : memref<16x8xf32, #tpu.memory_space<vmem>>, vector<16x8xf32>,
    return
  }
  func.func @transform_0(%arg0: i32) -> (i32, i32) {
    %c0_i32 = arith.constant 0 : i32
    %c0_i32_0 = arith.constant 0 : i32
    return %arg0, %c0_i32 : i32, i32
  }
  func.func @transform_1(%arg0: i32) -> (i32, i32) {
    %c0_i32 = arith.constant 0 : i32
    %c0_i32_0 = arith.constant 0 : i32
    %c0_i32_1 = arith.constant 0 : i32
    return %c0_i32, %c0_i32_0 : i32, i32
  }
  func.func @transform_2(%arg0: i32) -> (i32, i32) {
    %c0_i32 = arith.constant 0 : i32
    %c0_i32_0 = arith.constant 0 : i32
    %c0_i32_1 = arith.constant 0 : i32
    return %c0_i32, %c0_i32_0 : i32, i32
  }
  func.func @transform_3(%arg0: i32) -> (i32, i32) {
    %c0_i32 = arith.constant 0 : i32
    %c0_i32_0 = arith.constant 0 : i32
    %c0_i32_1 = arith.constant 0 : i32
    return %c0_i32, %c0_i32_0 : i32, i32
  }
  func.func @transform_4(%arg0: i32) -> (i32, i32) {
    %c0_i32 = arith.constant 0 : i32
    %c0_i32_0 = arith.constant 0 : i32
    %c0_i32_1 = arith.constant 0 : i32
    return %c0_i32, %c0_i32_0 : i32, i32
  }
  func.func @transform_5(%arg0: i32) -> (i32, i32) {
    %c0_i32 = arith.constant 0 : i32
    %c0_i32_0 = arith.constant 0 : i32
    %c0_i32_1 = arith.constant 0 : i32
    return %c0_i32, %c0_i32_0 : i32, i32
  }
  func.func @transform_6(%arg0: i32) -> (i32, i32) {
    %c0_i32 = arith.constant 0 : i32
    %c0_i32_0 = arith.constant 0 : i32
    %c0_i32_1 = arith.constant 0 : i32
    return %c0_i32, %c0_i32_0 : i32, i32
  }
  func.func @transform_7(%arg0: i32) -> (i32, i32) {
    %c0_i32 = arith.constant 0 : i32
    %c0_i32_0 = arith.constant 0 : i32
    return %c0_i32, %arg0 : i32, i32
  }
}

module attributes {stable_mosaic.version = 11 : i64} {
  func.func @_mlp_fused_kernel(%arg0: i32, %arg1: memref<8x32xf32, #tpu.memory_space<vmem>>, %arg2: memref<64x32xbf16, #tpu.memory_space<vmem>>, %arg3: memref<64x1xf32, #tpu.memory_space<vmem>>, %arg4: memref<48x64xbf16, #tpu.memory_space<vmem>>, %arg5: memref<48x1xf32, #tpu.memory_space<vmem>>, %arg6: memref<16x48xbf16, #tpu.memory_space<vmem>>, %arg7: memref<16x1xf32, #tpu.memory_space<vmem>>, %arg8: memref<16x8xf32, #tpu.memory_space<vmem>>) attributes {dimension_semantics = [#tpu.dimension_semantics<parallel>], iteration_bounds = array<i64: 1>, scalar_prefetch = 0 : i64, scratch_operands = 0 : i64, tpu.core_type = #tpu.core_type<tc>, window_params = [{transform_indices = @transform_0, window_bounds = array<i64: 8, 32>}, {pipeline_mode = #tpu.pipeline_mode<synchronous>, transform_indices = @transform_1, window_bounds = array<i64: 64, 32>}, {pipeline_mode = #tpu.pipeline_mode<synchronous>, transform_indices = @transform_2, window_bounds = array<i64: 64, 1>}, {pipeline_mode = #tpu.pipeline_mode<synchronous>, transform_indices = @transform_3, window_bounds = array<i64: 48, 64>}, {pipeline_mode = #tpu.pipeline_mode<synchronous>, transform_indices = @transform_4, window_bounds = array<i64: 48, 1>}, {pipeline_mode = #tpu.pipeline_mode<synchronous>, transform_indices = @transform_5, window_bounds = array<i64: 16, 48>}, {pipeline_mode = #tpu.pipeline_mode<synchronous>, transform_indices = @transform_6, window_bounds = array<i64: 16, 1>}, {transform_indices = @transform_7, window_bounds = array<i64: 16, 8>}]} {
    %c0 = arith.constant 0 : index
    %c0_0 = arith.constant 0 : index
    %0 = vector.load %arg2[%c0, %c0_0] : memref<64x32xbf16, #tpu.memory_space<vmem>>, vector<64x32xbf16>
    %c0_1 = arith.constant 0 : index
    %c0_2 = arith.constant 0 : index
    %1 = vector.load %arg1[%c0_1, %c0_2] : memref<8x32xf32, #tpu.memory_space<vmem>>, vector<8x32xf32>
    %2 = arith.truncf %1 : vector<8x32xf32> to vector<8x32xbf16>
    %cst = arith.constant dense<0.000000e+00> : vector<64x8xf32>
    %3 = tpu.matmul %0, %2, %cst {dimension_numbers = #tpu.dot_dimension_numbers<[1], [1], [0], [0], [0, 0, 1, 0], [], []>} : vector<64x32xbf16>, vector<8x32xbf16>, vector<64x8xf32> -> vector<64x8xf32>
    %c0_3 = arith.constant 0 : index
    %c0_4 = arith.constant 0 : index
    %4 = vector.load %arg3[%c0_3, %c0_4] : memref<64x1xf32, #tpu.memory_space<vmem>>, vector<64x1xf32>
    %5 = vector.broadcast %4 : vector<64x1xf32> to vector<64x8xf32>
    %6 = arith.addf %3, %5 : vector<64x8xf32>
    %7 = arith.truncf %6 : vector<64x8xf32> to vector<64x8xbf16>
    %cst_5 = arith.constant 0.000000e+00 : bf16
    %8 = vector.broadcast %cst_5 : bf16 to vector<64x8xbf16>
    %9 = arith.maximumf %7, %8 : vector<64x8xbf16>
    %c0_6 = arith.constant 0 : index
    %c0_7 = arith.constant 0 : index
    %10 = vector.load %arg4[%c0_6, %c0_7] : memref<48x64xbf16, #tpu.memory_space<vmem>>, vector<48x64xbf16>
    %cst_8 = arith.constant dense<0.000000e+00> : vector<48x8xf32>
    %11 = tpu.matmul %10, %9, %cst_8 {dimension_numbers = #tpu.dot_dimension_numbers<[1], [0], [0], [1], [0, 0, 1, 1], [], []>} : vector<48x64xbf16>, vector<64x8xbf16>, vector<48x8xf32> -> vector<48x8xf32>
    %c0_9 = arith.constant 0 : index
    %c0_10 = arith.constant 0 : index
    %12 = vector.load %arg5[%c0_9, %c0_10] : memref<48x1xf32, #tpu.memory_space<vmem>>, vector<48x1xf32>
    %13 = vector.broadcast %12 : vector<48x1xf32> to vector<48x8xf32>
    %14 = arith.addf %11, %13 : vector<48x8xf32>
    %15 = arith.truncf %14 : vector<48x8xf32> to vector<48x8xbf16>
    %cst_11 = arith.constant 0.000000e+00 : bf16
    %16 = vector.broadcast %cst_11 : bf16 to vector<48x8xbf16>
    %17 = arith.maximumf %15, %16 : vector<48x8xbf16>
    %c0_12 = arith.constant 0 : index
    %c0_13 = arith.constant 0 : index
    %18 = vector.load %arg6[%c0_12, %c0_13] : memref<16x48xbf16, #tpu.memory_space<vmem>>, vector<16x48xbf16>
    %cst_14 = arith.constant dense<0.000000e+00> : vector<16x8xf32>
    %19 = tpu.matmul %18, %17, %cst_14 {dimension_numbers = #tpu.dot_dimension_numbers<[1], [0], [0], [1], [0, 0, 1, 1], [], []>} : vector<16x48xbf16>, vector<48x8xbf16>, vector<16x8xf32> -> vector<16x8xf32>
    %c0_15 = arith.constant 0 : index
    %c0_16 = arith.constant 0 : index
    %20 = vector.load %arg7[%c0_15, %c0_16] : memref<16x1xf32, #tpu.memory_space<vmem>>, vector<16x1xf32>
    %21 = vector.broadcast %20 : vector<16x1xf32> to vector<16x8xf32>
    %22 = arith.addf %19, %21 : vector<16x8xf32>
    %c0_17 = arith.constant 0 : index
    %c0_18 = arith.constant 0 : index
    %23 = vector.load %arg8[%c0_17, %c0_18] : memref<16x8xf32, #tpu.memory_space<vmem>>, vector<16x8xf32>
    tpu.vector_store %arg8[%c0_17, %c0_18], %22 {strides = array<i32>} : memref<16x8xf32, #tpu.memory_space<vmem>>, vector<16x8xf32>,
    return
  }
  func.func @transform_0(%arg0: i32) -> (i32, i32) {
    %c0_i32 = arith.constant 0 : i32
    %c0_i32_0 = arith.constant 0 : i32
    return %arg0, %c0_i32 : i32, i32
  }
  func.func @transform_1(%arg0: i32) -> (i32, i32) {
    %c0_i32 = arith.constant 0 : i32
    %c0_i32_0 = arith.constant 0 : i32
    %c0_i32_1 = arith.constant 0 : i32
    return %c0_i32, %c0_i32_0 : i32, i32
  }
  func.func @transform_2(%arg0: i32) -> (i32, i32) {
    %c0_i32 = arith.constant 0 : i32
    %c0_i32_0 = arith.constant 0 : i32
    %c0_i32_1 = arith.constant 0 : i32
    return %c0_i32, %c0_i32_0 : i32, i32
  }
  func.func @transform_3(%arg0: i32) -> (i32, i32) {
    %c0_i32 = arith.constant 0 : i32
    %c0_i32_0 = arith.constant 0 : i32
    %c0_i32_1 = arith.constant 0 : i32
    return %c0_i32, %c0_i32_0 : i32, i32
  }
  func.func @transform_4(%arg0: i32) -> (i32, i32) {
    %c0_i32 = arith.constant 0 : i32
    %c0_i32_0 = arith.constant 0 : i32
    %c0_i32_1 = arith.constant 0 : i32
    return %c0_i32, %c0_i32_0 : i32, i32
  }
  func.func @transform_5(%arg0: i32) -> (i32, i32) {
    %c0_i32 = arith.constant 0 : i32
    %c0_i32_0 = arith.constant 0 : i32
    %c0_i32_1 = arith.constant 0 : i32
    return %c0_i32, %c0_i32_0 : i32, i32
  }
  func.func @transform_6(%arg0: i32) -> (i32, i32) {
    %c0_i32 = arith.constant 0 : i32
    %c0_i32_0 = arith.constant 0 : i32
    %c0_i32_1 = arith.constant 0 : i32
    return %c0_i32, %c0_i32_0 : i32, i32
  }
  func.func @transform_7(%arg0: i32) -> (i32, i32) {
    %c0_i32 = arith.constant 0 : i32
    %c0_i32_0 = arith.constant 0 : i32
    return %c0_i32, %arg0 : i32, i32
  }
}

</mosaic_0001>

<bundles_post_ra>
// kernel: tpu_custom_call.1
= control target key start
LH: loop header
LB: loop body
LE: loop exit
PB: predicated region body
PF: predicated region fallthrough
CT: control target
= control target key end

     0   :  { %vm105_vm0 = vcmask 261120   ;;  %v481_v1 = vmov 0   ;;  %v482_v24 = vmov 0.0   ;;  %vm483_vm1 = vmmov 0   ;;  %s635_s0 = inlined_call_operand.vmem [shape: f32[8,32], index: 0, kind: input, shape index: {}]   ;;  %s636_s1 = inlined_call_operand.vmem [shape: bf16[64,32], index: 1, kind: input, shape index: {}]   ;;  %s637_s2 = inlined_call_operand.vmem [shape: f32[64,1], index: 2, kind: input, shape index: {}]   ;;  %s638_s4 = inlined_call_operand.vmem [shape: f32[48,1], index: 4, kind: input, shape index: {}]   ;;  %s639_s6 = inlined_call_operand.vmem [shape: f32[16,1], index: 6, kind: input, shape index: {}]   ;;  %s640_s3 = inlined_call_operand.vmem [shape: bf16[48,64], index: 3, kind: input, shape index: {}]   ;;  %s641_s5 = inlined_call_operand.vmem [shape: bf16[16,48], index: 5, kind: input, shape index: {}]   ;;  %s642_s7 = inlined_call_operand.vmem [shape: f32[16,8], index: 7, kind: output, shape index: {}]  }
   0x1   :  { %v35_v0 = vld [vmem:[%s635_s0] sm:$0xff]  ;;  %471 = vset.pattern.permute.xlu0 %v481_v1  ;;  %472 = vset.pattern.permute.xlu1 %v481_v1  ;;  %v43_v5 = vld [vmem:[%s637_s2 + $0x30] sm:$0xff]  ;;  %v44_v7 = vld [vmem:[%s637_s2 + $0x38] sm:$0xff]  ;;  %vm251_vm2 = vcmask 523264   ;;  %vm343_vm3 = vcmask 392192   ;;  %vm388_vm4 = vcmask 64512  }
   0x2   :  { %v36_v2 = vpack.c.bf16 %v35_v0, %v35_v0  ;;  %v473_v3 = vld [vmem:[%s636_s1] sm:$0xff]   ;;  %77 = vperm.xlu0 %471, %v43_v5   ;;  %v474_v8 = vld [vmem:[%s636_s1 + $0x8] sm:$0xff]   ;;  %v475_v10 = vld [vmem:[%s636_s1 + $0x10] sm:$0xff]   ;;  %437 = vmatprep.subr.bf16.mxu1 %v482_v24 }
   0x3   :  { %429 = vmatprep.mubr.msk.bf16.mxu0 %vm105_vm0, %v473_v3  ;;  %v41_v6 = vld [vmem:[%s637_s2 + $0x20] sm:$0xff]  ;;  %v42_v9 = vld [vmem:[%s637_s2 + $0x28] sm:$0xff]  ;;  %v39_v11 = vld [vmem:[%s637_s2 + $0x10] sm:$0xff]  ;;  %445 = vmatprep.mubr.msk.bf16.mxu1 %vm483_vm1, %v482_v24 }
   0x4   :  { %467 = vmatprep.subr.msk.bf16.mxu0 %vm105_vm0, %v36_v2  ;;  %v119_v4 = vsel %vm105_vm0, %v36_v2, 0  ;;  %67 = vperm.xlu1 %472, %v41_v6   ;;  %v40_v12 = vld [vmem:[%s637_s2 + $0x18] sm:$0xff]  ;;  %v37_v13 = vld [vmem:[%s637_s2] sm:$0xff]  ;;  %v38_v15 = vld [vmem:[%s637_s2 + $0x8] sm:$0xff] }
   0x5   :  { %428 = vmatpush3.bf16.xpose.msra.mxu0 %v119_v4  ;;  %v476_v14 = vld [vmem:[%s636_s1 + $0x18] sm:$0xff]   ;;  %v204_v16 = vld [vmem:[%s638_s4 + $0x20] sm:$0xff]  ;;  %v205_v17 = vld [vmem:[%s638_s4 + $0x28] sm:$0xff] }
   0x6   :  { %82 = vperm.xlu0 %471, %v44_v7   ;;  %v202_v18 = vld [vmem:[%s638_s4 + $0x10] sm:$0xff]  ;;  %v203_v19 = vld [vmem:[%s638_s4 + $0x18] sm:$0xff]  ;;  %v200_v20 = vld [vmem:[%s638_s4] sm:$0xff]  ;;  %457 = vmatprep.subr.bf16.mxu0 %v482_v24 }
   0x7   :  { %v201_v21 = vld [vmem:[%s638_s4 + $0x8] sm:$0xff]  ;;  %v326_v22 = vld [vmem:[%s639_s6] sm:$0xff]  ;;  %v479_v59 = vld [vmem:[%s640_s3 + $0x10] sm:$0xff]  }
   0x8   :  { %72 = vperm.xlu1 %472, %v42_v9   ;;  %v327_v23 = vld [vmem:[%s639_s6 + $0x8] sm:$0xff]  ;;  %v477_v57 = vld [vmem:[%s640_s3] sm:$0xff]  }
   0x9   :  { %v478_v58 = vld [vmem:[%s640_s3 + $0x8] sm:$0xff]  }
   0xa   :  { %57 = vperm.xlu0 %471, %v39_v11  }
   0xc   :  { %430 = vmatmul.mubr.msk.bf16.vlgmr.msra.gmra.mxu0 %vm105_vm0, %v474_v8  ;;  %62 = vperm.xlu1 %472, %v40_v12  }
   0xd   :  { %433 = vmatprep.mubr.msk.bf16.mxu0 %vm105_vm0, %v475_v10 }
   0xe   :  { %47 = vperm.xlu0 %471, %v37_v13  }
  0x10   :  { %52 = vperm.xlu1 %472, %v38_v15  }
  0x12   :  { %228 = vperm.xlu0 %471, %v204_v16  }
  0x14   :  { %434 = vmatmul.mubr.msk.bf16.gmra.mxu0 %vm105_vm0, %v476_v14  ;;  %233 = vperm.xlu1 %472, %v205_v17  }
  0x15   :  { %463 = vmatprep.mubr.msk.bf16.mxu0 %vm483_vm1, %v482_v24 }
  0x16   :  { %218 = vperm.xlu0 %471, %v202_v18  }
  0x18   :  { %223 = vperm.xlu1 %472, %v203_v19  }
  0x1a   :  { %208 = vperm.xlu0 %471, %v200_v20  }
  0x1c   :  { %213 = vperm.xlu1 %472, %v201_v21  }
  0x1e   :  { %330 = vperm.xlu0 %471, %v326_v22  }
  0x20   :  { %335 = vperm.xlu1 %472, %v327_v23  }
  0x7d   :  { %v78_v28 = vpop.permute.xlu0 %77 }
  0x7f   :  { %v68_v26 = vpop.permute.xlu1 %67 }
  0x81   :  { %v83_v33 = vpop.permute.xlu0 %82 }
  0x83   :  { %v73_v31 = vpop.permute.xlu1 %72 }
  0x85   :  { %v58_v43 = vpop.permute.xlu0 %57 }
  0x87   :  { %v63_v38 = vpop.permute.xlu1 %62 }
  0x89   :  { %v48_v52 = vpop.permute.xlu0 %47 }
  0x8b   :  { %v53_v48 = vpop.permute.xlu1 %52 }
  0x8d   :  { %v229_v5 = vpop.permute.xlu0 %228 }
  0x8f   :  { %v234_v3 = vpop.permute.xlu1 %233 }
  0x91   :  { %v219_v10 = vpop.permute.xlu0 %218 }
  0x93   :  { %v224_v8 = vpop.permute.xlu1 %223 }
  0x95   :  { %v209_v22 = vpop.permute.xlu0 %208 }
  0x97   :  { %v214_v18 = vpop.permute.xlu1 %213 }
  0xcc   :  { %v431_v25 = vpop.f32.mrf.mxu0 }
  0xcd   :  { %v164_v47 = vadd.f32 %v431_v25, %v58_v43 }
  0xce   :  { %v155_v27 = vpop.f32.mrf.mxu0 }
  0xcf   :  { %v156_v53 = vadd.f32 %v155_v27, %v48_v52 }
  0xd0   :  { %v432_v29 = vpop.f32.mrf.mxu0 }
  0xd1   :  { %v167_v44 = vadd.f32 %v432_v29, %v63_v38  ;;  %v331_v29 = vpop.permute.xlu0 %330 }
  0xd2   :  { %v158_v30 = vpop.f32.mrf.mxu0 }
  0xd3   :  { %v187_v49 = vpack.c.bf16 %v167_v44, %v164_v47  ;;  %v159_v50 = vadd.f32 %v158_v30, %v53_v48 }
  0xd4   :  { %v435_v32 = vpop.f32.mrf.mxu0 }
  0xd5   :  { %v180_v36 = vadd.f32 %v435_v32, %v78_v28  ;;  %v186_v54 = vpack.c.bf16 %v159_v50, %v156_v53  ;;  %v191_v55 = vmax.bf16 %v481_v1, %v187_v49  ;;  %v480_v28 = vld [vmem:[%s641_s5] sm:$0xff]  }
  0xd6   :  { %v171_v34 = vpop.f32.mrf.mxu0 }
  0xd7   :  { %v172_v40 = vadd.f32 %v171_v34, %v68_v26  ;;  %v190_v56 = vmax.bf16 %v481_v1, %v186_v54 }
  0xd8   :  { %v436_v35 = vpop.f32.mrf.mxu0 }
  0xd9   :  { %v183_v37 = vadd.f32 %v436_v35, %v83_v33  ;;  %v336_v33 = vpop.permute.xlu1 %335 }
  0xda   :  { %v174_v39 = vpop.f32.mrf.mxu0 }
  0xdb   :  { %v189_v41 = vpack.c.bf16 %v183_v37, %v180_v36  ;;  %v175_v42 = vadd.f32 %v174_v39, %v73_v31 }
  0xdd   :  { %v188_v45 = vpack.c.bf16 %v175_v42, %v172_v40  ;;  %v193_v46 = vmax.bf16 %v481_v1, %v189_v41 }
  0xdf   :  { %438 = vmatpush3.bf16.msra.mxu1 %v193_v46  ;;  %v192_v51 = vmax.bf16 %v481_v1, %v188_v45 }
  0xe0   :  { %439 = vmatprep.subr.bf16.mxu1 %v482_v24 }
  0xe3   :  { %440 = vmatpush3.bf16.msra.mxu1 %v192_v51 }
  0xe4   :  { %441 = vmatprep.subr.bf16.mxu1 %v482_v24 }
  0xe7   :  { %442 = vmatpush3.bf16.msra.mxu1 %v191_v55 }
  0xe8   :  { %443 = vmatprep.subr.bf16.mxu1 %v482_v24 }
  0xeb   :  { %444 = vmatpush3.bf16.msra.mxu1 %v190_v56 }
  0xee   :  { %446 = vmatmul.mubr.msk.bf16.vlgmr.msra.gmra.mxu1 %vm251_vm2, %v477_v57 }
  0xef   :  { %449 = vmatprep.mubr.msk.bf16.mxu1 %vm483_vm1, %v482_v24 }
  0xf6   :  { %450 = vmatmul.mubr.msk.bf16.gmra.mxu1 %vm251_vm2, %v478_v58 }
  0xf7   :  { %453 = vmatprep.mubr.msk.bf16.mxu1 %vm483_vm1, %v482_v24 }
  0xfe   :  { %454 = vmatmul.mubr.msk.bf16.gmra.mxu1 %vm251_vm2, %v479_v59 }
 0x1ae   :  { %v295_v60 = vpop.f32.mrf.mxu1 }
 0x1af   :  { %v296_v23 = vadd.f32 %v295_v60, %v209_v22 }
 0x1b0   :  { %v447_v61 = vpop.f32.mrf.mxu1 }
 0x1b2   :  { %v298_v62 = vpop.f32.mrf.mxu1 }
 0x1b3   :  { %v299_v19 = vadd.f32 %v298_v62, %v214_v18 }
 0x1b4   :  { %v448_v63 = vpop.f32.mrf.mxu1 }
 0x1b5   :  { %v318_v25 = vpack.c.bf16 %v299_v19, %v296_v23 }
 0x1b6   :  { %v303_v0 = vpop.f32.mrf.mxu1 }
 0x1b7   :  { %v304_v16 = vadd.f32 %v303_v0, %v219_v10  ;;  %v321_v27 = vmax.bf16 %v481_v1, %v318_v25 }
 0x1b8   :  { %v451_v2 = vpop.f32.mrf.mxu1 }
 0x1ba   :  { %v306_v4 = vpop.f32.mrf.mxu1 }
 0x1bb   :  { %v307_v12 = vadd.f32 %v306_v4, %v224_v8 }
 0x1bc   :  { %v452_v6 = vpop.f32.mrf.mxu1 }
 0x1bd   :  { %v319_v20 = vpack.c.bf16 %v307_v12, %v304_v16 }
 0x1be   :  { %v311_v7 = vpop.f32.mrf.mxu1 }
 0x1bf   :  { %v312_v13 = vadd.f32 %v311_v7, %v229_v5  ;;  %v322_v26 = vmax.bf16 %v481_v1, %v319_v20 }
 0x1c0   :  { %v455_v9 = vpop.f32.mrf.mxu1 }
 0x1c2   :  { %v314_v11 = vpop.f32.mrf.mxu1 }
 0x1c3   :  { %v315_v14 = vadd.f32 %v314_v11, %v234_v3 }
 0x1c4   :  { %v456_v15 = vpop.f32.mrf.mxu1 }
 0x1c5   :  { %v320_v17 = vpack.c.bf16 %v315_v14, %v312_v13 }
 0x1c7   :  { %v323_v21 = vmax.bf16 %v481_v1, %v320_v17 }
 0x1c9   :  { %458 = vmatpush3.bf16.msra.mxu0 %v323_v21 }
 0x1ca   :  { %459 = vmatprep.subr.bf16.mxu0 %v482_v24 }
 0x1cd   :  { %460 = vmatpush3.bf16.msra.mxu0 %v322_v26 }
 0x1ce   :  { %461 = vmatprep.subr.bf16.mxu0 %v482_v24 }
 0x1d1   :  { %462 = vmatpush3.bf16.msra.mxu0 %v321_v27 }
 0x1d4   :  { %464 = vmatmul.mubr.msk.bf16.vlgmr.msra.gmra.mxu0 %vm343_vm3, %v480_v28 }
 0x294   :  { %v381_v30 = vpop.f32.mrf.mxu0 }
 0x295   :  { %v382_v31 = vadd.f32 %v381_v30, %v331_v29 }
 0x296   :  { %v465_v32 = vpop.f32.mrf.mxu0 }
 0x297   :  { %389 = vst.msk [vmem:[%s642_s7] sm:$0xff] %vm388_vm4, %v382_v31 }
 0x298   :  { %v384_v24 = vpop.f32.mrf.mxu0 }
 0x299   :  { %v385_v34 = vadd.f32 %v384_v24, %v336_v33 }
 0x29a   :  { %v466_v1 = vpop.f32.mrf.mxu0 }
 0x29b   :  { %390 = vst.msk [vmem:[%s642_s7 + $0x8] sm:$0xff] %vm388_vm4, %v385_v34 }

// kernel: tpu_custom_call.1
= control target key start
LH: loop header
LB: loop body
LE: loop exit
PB: predicated region body
PF: predicated region fallthrough
CT: control target
= control target key end

     0   :  { %vm105_vm0 = vcmask 261120   ;;  %v481_v1 = vmov 0   ;;  %v482_v24 = vmov 0.0   ;;  %vm483_vm1 = vmmov 0   ;;  %s635_s0 = inlined_call_operand.vmem [shape: f32[8,32], index: 0, kind: input, shape index: {}]   ;;  %s636_s1 = inlined_call_operand.vmem [shape: bf16[64,32], index: 1, kind: input, shape index: {}]   ;;  %s637_s2 = inlined_call_operand.vmem [shape: f32[64,1], index: 2, kind: input, shape index: {}]   ;;  %s638_s4 = inlined_call_operand.vmem [shape: f32[48,1], index: 4, kind: input, shape index: {}]   ;;  %s639_s6 = inlined_call_operand.vmem [shape: f32[16,1], index: 6, kind: input, shape index: {}]   ;;  %s640_s3 = inlined_call_operand.vmem [shape: bf16[48,64], index: 3, kind: input, shape index: {}]   ;;  %s641_s5 = inlined_call_operand.vmem [shape: bf16[16,48], index: 5, kind: input, shape index: {}]   ;;  %s642_s7 = inlined_call_operand.vmem [shape: f32[16,8], index: 7, kind: output, shape index: {}]  }
   0x1   :  { %v35_v0 = vld [vmem:[%s635_s0] sm:$0xff]  ;;  %471 = vset.pattern.permute.xlu0 %v481_v1  ;;  %472 = vset.pattern.permute.xlu1 %v481_v1  ;;  %v43_v5 = vld [vmem:[%s637_s2 + $0x30] sm:$0xff]  ;;  %v44_v7 = vld [vmem:[%s637_s2 + $0x38] sm:$0xff]  ;;  %vm251_vm2 = vcmask 523264   ;;  %vm343_vm3 = vcmask 392192   ;;  %vm388_vm4 = vcmask 64512  }
   0x2   :  { %v36_v2 = vpack.c.bf16 %v35_v0, %v35_v0  ;;  %v473_v3 = vld [vmem:[%s636_s1] sm:$0xff]   ;;  %77 = vperm.xlu0 %471, %v43_v5   ;;  %v474_v8 = vld [vmem:[%s636_s1 + $0x8] sm:$0xff]   ;;  %v475_v10 = vld [vmem:[%s636_s1 + $0x10] sm:$0xff]   ;;  %437 = vmatprep.subr.bf16.mxu1 %v482_v24 }
   0x3   :  { %429 = vmatprep.mubr.msk.bf16.mxu0 %vm105_vm0, %v473_v3  ;;  %v41_v6 = vld [vmem:[%s637_s2 + $0x20] sm:$0xff]  ;;  %v42_v9 = vld [vmem:[%s637_s2 + $0x28] sm:$0xff]  ;;  %v39_v11 = vld [vmem:[%s637_s2 + $0x10] sm:$0xff]  ;;  %445 = vmatprep.mubr.msk.bf16.mxu1 %vm483_vm1, %v482_v24 }
   0x4   :  { %467 = vmatprep.subr.msk.bf16.mxu0 %vm105_vm0, %v36_v2  ;;  %v119_v4 = vsel %vm105_vm0, %v36_v2, 0  ;;  %67 = vperm.xlu1 %472, %v41_v6   ;;  %v40_v12 = vld [vmem:[%s637_s2 + $0x18] sm:$0xff]  ;;  %v37_v13 = vld [vmem:[%s637_s2] sm:$0xff]  ;;  %v38_v15 = vld [vmem:[%s637_s2 + $0x8] sm:$0xff] }
   0x5   :  { %428 = vmatpush3.bf16.xpose.msra.mxu0 %v119_v4  ;;  %v476_v14 = vld [vmem:[%s636_s1 + $0x18] sm:$0xff]   ;;  %v204_v16 = vld [vmem:[%s638_s4 + $0x20] sm:$0xff]  ;;  %v205_v17 = vld [vmem:[%s638_s4 + $0x28] sm:$0xff] }
   0x6   :  { %82 = vperm.xlu0 %471, %v44_v7   ;;  %v202_v18 = vld [vmem:[%s638_s4 + $0x10] sm:$0xff]  ;;  %v203_v19 = vld [vmem:[%s638_s4 + $0x18] sm:$0xff]  ;;  %v200_v20 = vld [vmem:[%s638_s4] sm:$0xff]  ;;  %457 = vmatprep.subr.bf16.mxu0 %v482_v24 }
   0x7   :  { %v201_v21 = vld [vmem:[%s638_s4 + $0x8] sm:$0xff]  ;;  %v326_v22 = vld [vmem:[%s639_s6] sm:$0xff]  ;;  %v479_v59 = vld [vmem:[%s640_s3 + $0x10] sm:$0xff]  }
   0x8   :  { %72 = vperm.xlu1 %472, %v42_v9   ;;  %v327_v23 = vld [vmem:[%s639_s6 + $0x8] sm:$0xff]  ;;  %v477_v57 = vld [vmem:[%s640_s3] sm:$0xff]  }
   0x9   :  { %v478_v58 = vld [vmem:[%s640_s3 + $0x8] sm:$0xff]  }
   0xa   :  { %57 = vperm.xlu0 %471, %v39_v11  }
   0xc   :  { %430 = vmatmul.mubr.msk.bf16.vlgmr.msra.gmra.mxu0 %vm105_vm0, %v474_v8  ;;  %62 = vperm.xlu1 %472, %v40_v12  }
   0xd   :  { %433 = vmatprep.mubr.msk.bf16.mxu0 %vm105_vm0, %v475_v10 }
   0xe   :  { %47 = vperm.xlu0 %471, %v37_v13  }
  0x10   :  { %52 = vperm.xlu1 %472, %v38_v15  }
  0x12   :  { %228 = vperm.xlu0 %471, %v204_v16  }
  0x14   :  { %434 = vmatmul.mubr.msk.bf16.gmra.mxu0 %vm105_vm0, %v476_v14  ;;  %233 = vperm.xlu1 %472, %v205_v17  }
  0x15   :  { %463 = vmatprep.mubr.msk.bf16.mxu0 %vm483_vm1, %v482_v24 }
  0x16   :  { %218 = vperm.xlu0 %471, %v202_v18  }
  0x18   :  { %223 = vperm.xlu1 %472, %v203_v19  }
  0x1a   :  { %208 = vperm.xlu0 %471, %v200_v20  }
  0x1c   :  { %213 = vperm.xlu1 %472, %v201_v21  }
  0x1e   :  { %330 = vperm.xlu0 %471, %v326_v22  }
  0x20   :  { %335 = vperm.xlu1 %472, %v327_v23  }
  0x7d   :  { %v78_v28 = vpop.permute.xlu0 %77 }
  0x7f   :  { %v68_v26 = vpop.permute.xlu1 %67 }
  0x81   :  { %v83_v33 = vpop.permute.xlu0 %82 }
  0x83   :  { %v73_v31 = vpop.permute.xlu1 %72 }
  0x85   :  { %v58_v43 = vpop.permute.xlu0 %57 }
  0x87   :  { %v63_v38 = vpop.permute.xlu1 %62 }
  0x89   :  { %v48_v52 = vpop.permute.xlu0 %47 }
  0x8b   :  { %v53_v48 = vpop.permute.xlu1 %52 }
  0x8d   :  { %v229_v5 = vpop.permute.xlu0 %228 }
  0x8f   :  { %v234_v3 = vpop.permute.xlu1 %233 }
  0x91   :  { %v219_v10 = vpop.permute.xlu0 %218 }
  0x93   :  { %v224_v8 = vpop.permute.xlu1 %223 }
  0x95   :  { %v209_v22 = vpop.permute.xlu0 %208 }
  0x97   :  { %v214_v18 = vpop.permute.xlu1 %213 }
  0xcc   :  { %v431_v25 = vpop.f32.mrf.mxu0 }
  0xcd   :  { %v164_v47 = vadd.f32 %v431_v25, %v58_v43 }
  0xce   :  { %v155_v27 = vpop.f32.mrf.mxu0 }
  0xcf   :  { %v156_v53 = vadd.f32 %v155_v27, %v48_v52 }
  0xd0   :  { %v432_v29 = vpop.f32.mrf.mxu0 }
  0xd1   :  { %v167_v44 = vadd.f32 %v432_v29, %v63_v38  ;;  %v331_v29 = vpop.permute.xlu0 %330 }
  0xd2   :  { %v158_v30 = vpop.f32.mrf.mxu0 }
  0xd3   :  { %v187_v49 = vpack.c.bf16 %v167_v44, %v164_v47  ;;  %v159_v50 = vadd.f32 %v158_v30, %v53_v48 }
  0xd4   :  { %v435_v32 = vpop.f32.mrf.mxu0 }
  0xd5   :  { %v180_v36 = vadd.f32 %v435_v32, %v78_v28  ;;  %v186_v54 = vpack.c.bf16 %v159_v50, %v156_v53  ;;  %v191_v55 = vmax.bf16 %v481_v1, %v187_v49  ;;  %v480_v28 = vld [vmem:[%s641_s5] sm:$0xff]  }
  0xd6   :  { %v171_v34 = vpop.f32.mrf.mxu0 }
  0xd7   :  { %v172_v40 = vadd.f32 %v171_v34, %v68_v26  ;;  %v190_v56 = vmax.bf16 %v481_v1, %v186_v54 }
  0xd8   :  { %v436_v35 = vpop.f32.mrf.mxu0 }
  0xd9   :  { %v183_v37 = vadd.f32 %v436_v35, %v83_v33  ;;  %v336_v33 = vpop.permute.xlu1 %335 }
  0xda   :  { %v174_v39 = vpop.f32.mrf.mxu0 }
  0xdb   :  { %v189_v41 = vpack.c.bf16 %v183_v37, %v180_v36  ;;  %v175_v42 = vadd.f32 %v174_v39, %v73_v31 }
  0xdd   :  { %v188_v45 = vpack.c.bf16 %v175_v42, %v172_v40  ;;  %v193_v46 = vmax.bf16 %v481_v1, %v189_v41 }
  0xdf   :  { %438 = vmatpush3.bf16.msra.mxu1 %v193_v46  ;;  %v192_v51 = vmax.bf16 %v481_v1, %v188_v45 }
  0xe0   :  { %439 = vmatprep.subr.bf16.mxu1 %v482_v24 }
  0xe3   :  { %440 = vmatpush3.bf16.msra.mxu1 %v192_v51 }
  0xe4   :  { %441 = vmatprep.subr.bf16.mxu1 %v482_v24 }
  0xe7   :  { %442 = vmatpush3.bf16.msra.mxu1 %v191_v55 }
  0xe8   :  { %443 = vmatprep.subr.bf16.mxu1 %v482_v24 }
  0xeb   :  { %444 = vmatpush3.bf16.msra.mxu1 %v190_v56 }
  0xee   :  { %446 = vmatmul.mubr.msk.bf16.vlgmr.msra.gmra.mxu1 %vm251_vm2, %v477_v57 }
  0xef   :  { %449 = vmatprep.mubr.msk.bf16.mxu1 %vm483_vm1, %v482_v24 }
  0xf6   :  { %450 = vmatmul.mubr.msk.bf16.gmra.mxu1 %vm251_vm2, %v478_v58 }
  0xf7   :  { %453 = vmatprep.mubr.msk.bf16.mxu1 %vm483_vm1, %v482_v24 }
  0xfe   :  { %454 = vmatmul.mubr.msk.bf16.gmra.mxu1 %vm251_vm2, %v479_v59 }
 0x1ae   :  { %v295_v60 = vpop.f32.mrf.mxu1 }
 0x1af   :  { %v296_v23 = vadd.f32 %v295_v60, %v209_v22 }
 0x1b0   :  { %v447_v61 = vpop.f32.mrf.mxu1 }
 0x1b2   :  { %v298_v62 = vpop.f32.mrf.mxu1 }
 0x1b3   :  { %v299_v19 = vadd.f32 %v298_v62, %v214_v18 }
 0x1b4   :  { %v448_v63 = vpop.f32.mrf.mxu1 }
 0x1b5   :  { %v318_v25 = vpack.c.bf16 %v299_v19, %v296_v23 }
 0x1b6   :  { %v303_v0 = vpop.f32.mrf.mxu1 }
 0x1b7   :  { %v304_v16 = vadd.f32 %v303_v0, %v219_v10  ;;  %v321_v27 = vmax.bf16 %v481_v1, %v318_v25 }
 0x1b8   :  { %v451_v2 = vpop.f32.mrf.mxu1 }
 0x1ba   :  { %v306_v4 = vpop.f32.mrf.mxu1 }
 0x1bb   :  { %v307_v12 = vadd.f32 %v306_v4, %v224_v8 }
 0x1bc   :  { %v452_v6 = vpop.f32.mrf.mxu1 }
 0x1bd   :  { %v319_v20 = vpack.c.bf16 %v307_v12, %v304_v16 }
 0x1be   :  { %v311_v7 = vpop.f32.mrf.mxu1 }
 0x1bf   :  { %v312_v13 = vadd.f32 %v311_v7, %v229_v5  ;;  %v322_v26 = vmax.bf16 %v481_v1, %v319_v20 }
 0x1c0   :  { %v455_v9 = vpop.f32.mrf.mxu1 }
 0x1c2   :  { %v314_v11 = vpop.f32.mrf.mxu1 }
 0x1c3   :  { %v315_v14 = vadd.f32 %v314_v11, %v234_v3 }
 0x1c4   :  { %v456_v15 = vpop.f32.mrf.mxu1 }
 0x1c5   :  { %v320_v17 = vpack.c.bf16 %v315_v14, %v312_v13 }
 0x1c7   :  { %v323_v21 = vmax.bf16 %v481_v1, %v320_v17 }
 0x1c9   :  { %458 = vmatpush3.bf16.msra.mxu0 %v323_v21 }
 0x1ca   :  { %459 = vmatprep.subr.bf16.mxu0 %v482_v24 }
 0x1cd   :  { %460 = vmatpush3.bf16.msra.mxu0 %v322_v26 }
 0x1ce   :  { %461 = vmatprep.subr.bf16.mxu0 %v482_v24 }
 0x1d1   :  { %462 = vmatpush3.bf16.msra.mxu0 %v321_v27 }
 0x1d4   :  { %464 = vmatmul.mubr.msk.bf16.vlgmr.msra.gmra.mxu0 %vm343_vm3, %v480_v28 }
 0x294   :  { %v381_v30 = vpop.f32.mrf.mxu0 }
 0x295   :  { %v382_v31 = vadd.f32 %v381_v30, %v331_v29 }
 0x296   :  { %v465_v32 = vpop.f32.mrf.mxu0 }
 0x297   :  { %389 = vst.msk [vmem:[%s642_s7] sm:$0xff] %vm388_vm4, %v382_v31 }
 0x298   :  { %v384_v24 = vpop.f32.mrf.mxu0 }
 0x299   :  { %v385_v34 = vadd.f32 %v384_v24, %v336_v33 }
 0x29a   :  { %v466_v1 = vpop.f32.mrf.mxu0 }
 0x29b   :  { %390 = vst.msk [vmem:[%s642_s7 + $0x8] sm:$0xff] %vm388_vm4, %v385_v34 }

</bundles_post_ra>
